<compile_context>
chip_gen: v5e
topology: v5e:2x2
jax: 0.10.0
libtpu: 0.0.40
codegen_flags: <defaults>
</compile_context>

<pallas_src>
import functools

import jax
import jax.numpy as jnp
from jax import lax
from jax.experimental import pallas as pl
from jax.experimental.pallas import tpu as pltpu

_EPS = 1e-5  # PyTorch BatchNorm2d default eps


def _round_up(x, m):
    return (x + m - 1) // m * m


def _fill_patches(patch_ref, x_cm, mask_ref, C, W, L):
    """Write the (9*C, L) im2col patches of a 3x3 'same' conv into patch_ref.

    x_cm is (C, L) with L = N*H*W laid out image-major on the lane axis.
    Each tap is one lane roll (XLU) + one multiply by a precomputed boundary
    mask row; positions that wrap across image boundaries are exactly the
    out-of-image positions, so the mask zeroes them.
    """
    t = 0
    for di in (-1, 0, 1):
        for dj in (-1, 0, 1):
            d = di * W + dj                      # flat source offset
            shift = (-d) % L                     # jnp.roll-style shift
            rolled = pltpu.roll(x_cm, shift=shift, axis=1) if shift else x_cm
            patch_ref[t * C:(t + 1) * C, :] = rolled * mask_ref[t:t + 1, :]
            t += 1


def _bn_relu(y, gamma, beta, inv_count):
    """Training-mode BatchNorm (batch stats computed here, f32) + ReLU."""
    mean = jnp.sum(y, axis=1, keepdims=True) * inv_count
    var = jnp.sum(y * y, axis=1, keepdims=True) * inv_count - mean * mean
    a = gamma * lax.rsqrt(jnp.maximum(var, 0.0) + _EPS)
    b = beta - mean * a
    return jnp.maximum(y * a + b, 0.0)


def _conv_block_kernel(W, cin_p, cout_p, inv_count, compute_dtype,
                       xt_ref, mask_ref, w1_ref, w2_ref, bn_ref,
                       out_ref, patch_ref):
    L = out_ref.shape[-1]

    # ---- conv1: one im2col matmul over the whole batch (lane width N*H*W).
    #      Conv bias omitted: it cancels in the BatchNorm mean subtraction.
    _fill_patches(patch_ref, xt_ref[...], mask_ref, cin_p, W, L)
    y1 = jnp.dot(w1_ref[...], patch_ref[0:9 * cin_p, :],
                 preferred_element_type=jnp.float32)           # (cout_p, L) f32

    # ---- BN1 (on-chip batch stats) + ReLU
    h1 = _bn_relu(y1, bn_ref[:, 0:1], bn_ref[:, 1:2], inv_count)

    # ---- conv2 (reuses the same patch scratch)
    _fill_patches(patch_ref, h1.astype(compute_dtype), mask_ref, cout_p, W, L)
    y2 = jnp.dot(w2_ref[...], patch_ref[0:9 * cout_p, :],
                 preferred_element_type=jnp.float32)           # (cout_p, L) f32

    # ---- BN2 + ReLU
    out_ref[...] = _bn_relu(y2, bn_ref[:, 2:3], bn_ref[:, 3:4], inv_count)


def conv_block_forward(x_nchw, t, params, compute_dtype=jnp.float32):
    N, in_ch, H, W = x_nchw.shape
    out_ch = params["w_conv1"].shape[0]
    HW = H * W
    L = N * HW                       # lane axis of the fused kernel
    cin_p = _round_up(in_ch, 8)      # pad channels to sublane multiple
    cout_p = _round_up(out_ch, 8)
    cmax = max(cin_p, cout_p)
    f32 = jnp.float32

    # ---- time-embedding MLP + broadcast add (tiny 1-lane matmuls; done in
    #      XLA and fused with the layout change below).  Linear: y = x@W.T+b.
    h = jnp.maximum(t.astype(f32) @ params["w_lin1"].astype(f32).T
                    + params["b_lin1"].astype(f32), 0.0)
    temb = h @ params["w_lin2"].astype(f32).T + params["b_lin2"].astype(f32)
    xt = x_nchw.astype(f32) + temb[:, :, None, None]            # (N,Cin,H,W)

    # ---- channel-major over the whole batch: (Cin_p, N*H*W), lane-dense.
    xt_cm = jnp.pad(jnp.transpose(xt, (1, 0, 2, 3)).reshape(in_ch, L),
                    ((0, cin_p - in_ch), (0, 0))).astype(compute_dtype)

    # ---- 3x3 'same' boundary masks (one row per tap), tiled across the
    #      batch and padded to 16 rows for clean sublane tiling.
    hw = jnp.arange(HW, dtype=jnp.int32)
    h_idx, w_idx = hw // W, hw % W
    rows = []
    for di in (-1, 0, 1):
        for dj in (-1, 0, 1):
            rows.append((h_idx + di >= 0) & (h_idx + di < H) &
                        (w_idx + dj >= 0) & (w_idx + dj < W))
    mask = jnp.stack(rows).astype(compute_dtype)                 # (9, HW)
    mask = jnp.pad(jnp.tile(mask, (1, N)), ((0, 16 - 9), (0, 0)))  # (16, L)

    # ---- conv weights in im2col form (OIHW -> (Cout_p, 9*Ci_p)).
    def conv_w2d(w_oihw, ci_p):
        co, ci = w_oihw.shape[0], w_oihw.shape[1]
        w = jnp.pad(w_oihw.astype(f32),
                    ((0, cout_p - co), (0, ci_p - ci), (0, 0), (0, 0)))
        return (jnp.transpose(w, (0, 2, 3, 1))
                .reshape(cout_p, 9 * ci_p).astype(compute_dtype))

    w1_2d = conv_w2d(params["w_conv1"], cin_p)
    w2_2d = conv_w2d(params["w_conv2"], cout_p)
    # Conv biases intentionally unused (cancelled by training-mode BN).

    def bn_pad(v):
        return jnp.pad(v.astype(f32), (0, cout_p - out_ch))
    bnp = jnp.stack([bn_pad(params["bn1_gamma"]), bn_pad(params["bn1_beta"]),
                     bn_pad(params["bn2_gamma"]), bn_pad(params["bn2_beta"])],
                    axis=1)                                      # (cout_p, 4)

    def full_spec(shape):
        nd = len(shape)
        return pl.BlockSpec(shape, lambda i, _nd=nd: (0,) * _nd)

    inputs = (xt_cm, mask, w1_2d, w2_2d, bnp)
    bytes_accessed = (sum(a.size * a.dtype.itemsize for a in inputs)
                      + cout_p * L * 4)

    out_cm = pl.pallas_call(
        functools.partial(_conv_block_kernel, W, cin_p, cout_p,
                          1.0 / (N * HW), compute_dtype),
        grid=(1,),
        in_specs=[full_spec(a.shape) for a in inputs],
        out_specs=full_spec((cout_p, L)),
        out_shape=jax.ShapeDtypeStruct((cout_p, L), f32),
        scratch_shapes=[pltpu.VMEM((9 * cmax, L), compute_dtype)],
        compiler_params=pltpu.CompilerParams(
            dimension_semantics=("arbitrary",),
            vmem_limit_bytes=32 * 1024 * 1024),      # fits v5e/v6e/v7x scoped VMEM
        cost_estimate=pl.CostEstimate(
            flops=2 * L * 9 * (cin_p * cout_p + cout_p * cout_p),
            transcendentals=2 * cout_p,
            bytes_accessed=int(bytes_accessed)),
    )(*inputs)

    # Un-pad channels and restore NCHW.
    return jnp.transpose(out_cm[:out_ch].reshape(out_ch, N, H, W), (1, 0, 2, 3))


def conv_block_reference(x_nchw, t, params):
    """Pure-JAX reference mirroring the PyTorch forward (training-mode BN)."""
    h = jnp.maximum(t @ params["w_lin1"].T + params["b_lin1"], 0.0)
    temb = h @ params["w_lin2"].T + params["b_lin2"]               # (N, Cin)
    x = x_nchw + temb[:, :, None, None]

    def conv_bn_relu(xin, w_oihw, b, gamma, beta):
        y = lax.conv_general_dilated(
            xin, w_oihw, (1, 1), "SAME",
            dimension_numbers=("NCHW", "OIHW", "NCHW")) + b[None, :, None, None]
        mean = jnp.mean(y, axis=(0, 2, 3), keepdims=True)
        var = jnp.mean((y - mean) ** 2, axis=(0, 2, 3), keepdims=True)
        yn = (y - mean) / jnp.sqrt(var + _EPS)
        return jnp.maximum(
            yn * gamma[None, :, None, None] + beta[None, :, None, None], 0.0)

    h1 = conv_bn_relu(x, params["w_conv1"], params["b_conv1"],
                      params["bn1_gamma"], params["bn1_beta"])
    return conv_bn_relu(h1, params["w_conv2"], params["b_conv2"],
                        params["bn2_gamma"], params["bn2_beta"])


if __name__ == "__main__":
    N, in_ch, out_ch, time_dim, H, W = 2, 4, 8, 8, 16, 16
    key = jax.random.PRNGKey(0)
    ks = jax.random.split(key, 10)

    params = {
        # nn.Linear(time_dim, in_ch), nn.Linear(in_ch, in_ch)
        "w_lin1": 0.1 * jax.random.normal(ks[0], (in_ch, time_dim), jnp.float32),
        "b_lin1": 0.05 * jax.random.normal(ks[1], (in_ch,), jnp.float32),
        "w_lin2": 0.1 * jax.random.normal(ks[2], (in_ch, in_ch), jnp.float32),
        "b_lin2": 0.05 * jax.random.normal(ks[3], (in_ch,), jnp.float32),
        # nn.Conv2d(in_ch, out_ch, 3, padding=1), nn.Conv2d(out_ch, out_ch, 3, padding=1)
        "w_conv1": 0.1 * jax.random.normal(ks[4], (out_ch, in_ch, 3, 3), jnp.float32),
        "b_conv1": 0.05 * jax.random.normal(ks[5], (out_ch,), jnp.float32),
        "w_conv2": 0.1 * jax.random.normal(ks[6], (out_ch, out_ch, 3, 3), jnp.float32),
        "b_conv2": 0.05 * jax.random.normal(ks[7], (out_ch,), jnp.float32),
        # nn.BatchNorm2d(out_ch) affine params (gamma=1, beta=0 at init)
        "bn1_gamma": jnp.ones((out_ch,), jnp.float32),
        "bn1_beta": jnp.zeros((out_ch,), jnp.float32),
        "bn2_gamma": jnp.ones((out_ch,), jnp.float32),
        "bn2_beta": jnp.zeros((out_ch,), jnp.float32),
    }

    x = jax.random.normal(ks[8], (N, in_ch, H, W), jnp.float32)
    t = jax.random.normal(ks[9], (N, time_dim), jnp.float32)

    fwd = jax.jit(conv_block_forward, static_argnames=("compute_dtype",))
    ref = jax.block_until_ready(conv_block_reference(x, t, params))

    # f32 MXU inputs: tight tolerance.
    out_f32 = jax.block_until_ready(fwd(x, t, params, compute_dtype=jnp.float32))
    assert out_f32.shape == (N, out_ch, H, W), out_f32.shape
    err_f32 = float(jnp.max(jnp.abs(out_f32 - ref)))
    assert jnp.allclose(out_f32, ref, rtol=2e-3, atol=2e-3), err_f32

    # bf16 MXU inputs (v6e/v7x-friendly), f32 accumulation: relaxed tolerance.
    out_bf16 = jax.block_until_ready(fwd(x, t, params, compute_dtype=jnp.bfloat16))
    err_bf16 = float(jnp.max(jnp.abs(out_bf16 - ref)))
    assert jnp.allclose(out_bf16, ref, rtol=5e-2, atol=5e-2), err_bf16

    print("KERNEL_OK")
</pallas_src>

<mosaic_0001>
module attributes {stable_mosaic.version = 11 : i64} {
  func.func @_conv_block_kernel(%arg0: i32, %arg1: memref<8x512xf32, #tpu.memory_space<vmem>>, %arg2: memref<16x512xf32, #tpu.memory_space<vmem>>, %arg3: memref<8x72xf32, #tpu.memory_space<vmem>>, %arg4: memref<8x72xf32, #tpu.memory_space<vmem>>, %arg5: memref<8x4xf32, #tpu.memory_space<vmem>>, %arg6: memref<8x512xf32, #tpu.memory_space<vmem>>, %arg7: memref<72x512xf32, #tpu.memory_space<vmem>>) attributes {dimension_semantics = [#tpu.dimension_semantics<arbitrary>], iteration_bounds = array<i64: 1>, scalar_prefetch = 0 : i64, scratch_operands = 1 : i64, tpu.core_type = #tpu.core_type<tc>, window_params = [{pipeline_mode = #tpu.pipeline_mode<synchronous>, transform_indices = @transform_0, window_bounds = array<i64: 8, 512>}, {pipeline_mode = #tpu.pipeline_mode<synchronous>, transform_indices = @transform_1, window_bounds = array<i64: 16, 512>}, {pipeline_mode = #tpu.pipeline_mode<synchronous>, transform_indices = @transform_2, window_bounds = array<i64: 8, 72>}, {pipeline_mode = #tpu.pipeline_mode<synchronous>, transform_indices = @transform_3, window_bounds = array<i64: 8, 72>}, {pipeline_mode = #tpu.pipeline_mode<synchronous>, transform_indices = @transform_4, window_bounds = array<i64: 8, 4>}, {pipeline_mode = #tpu.pipeline_mode<synchronous>, transform_indices = @transform_5, window_bounds = array<i64: 8, 512>}]} {
    %c0 = arith.constant 0 : index
    %c0_0 = arith.constant 0 : index
    %0 = vector.load %arg1[%c0, %c0_0] : memref<8x512xf32, #tpu.memory_space<vmem>>, vector<8x512xf32>
    %c17_i32 = arith.constant 17 : i32
    %1 = tpu.dynamic_rotate %0 by %c17_i32 dim 1 : vector<8x512xf32>, i32 -> vector<8x512xf32>
    %c0_1 = arith.constant 0 : index
    %c0_2 = arith.constant 0 : index
    %2 = vector.load %arg2[%c0_1, %c0_2] : memref<16x512xf32, #tpu.memory_space<vmem>>, vector<1x512xf32>
    %3 = vector.broadcast %2 : vector<1x512xf32> to vector<8x512xf32>
    %4 = arith.mulf %1, %3 : vector<8x512xf32>
    %c0_3 = arith.constant 0 : index
    %c0_4 = arith.constant 0 : index
    %5 = vector.load %arg7[%c0_3, %c0_4] : memref<72x512xf32, #tpu.memory_space<vmem>>, vector<8x512xf32>
    tpu.vector_store %arg7[%c0_3, %c0_4], %4 {strides = array<i32>} : memref<72x512xf32, #tpu.memory_space<vmem>>, vector<8x512xf32>,
    %c16_i32 = arith.constant 16 : i32
    %6 = tpu.dynamic_rotate %0 by %c16_i32 dim 1 : vector<8x512xf32>, i32 -> vector<8x512xf32>
    %c1 = arith.constant 1 : index
    %c0_5 = arith.constant 0 : index
    %7 = vector.load %arg2[%c1, %c0_5] : memref<16x512xf32, #tpu.memory_space<vmem>>, vector<1x512xf32>
    %8 = vector.broadcast %7 : vector<1x512xf32> to vector<8x512xf32>
    %9 = arith.mulf %6, %8 : vector<8x512xf32>
    %c8 = arith.constant 8 : index
    %c0_6 = arith.constant 0 : index
    %10 = vector.load %arg7[%c8, %c0_6] : memref<72x512xf32, #tpu.memory_space<vmem>>, vector<8x512xf32>
    tpu.vector_store %arg7[%c8, %c0_6], %9 {strides = array<i32>} : memref<72x512xf32, #tpu.memory_space<vmem>>, vector<8x512xf32>,
    %c15_i32 = arith.constant 15 : i32
    %11 = tpu.dynamic_rotate %0 by %c15_i32 dim 1 : vector<8x512xf32>, i32 -> vector<8x512xf32>
    %c2 = arith.constant 2 : index
    %c0_7 = arith.constant 0 : index
    %12 = vector.load %arg2[%c2, %c0_7] : memref<16x512xf32, #tpu.memory_space<vmem>>, vector<1x512xf32>
    %13 = vector.broadcast %12 : vector<1x512xf32> to vector<8x512xf32>
    %14 = arith.mulf %11, %13 : vector<8x512xf32>
    %c16 = arith.constant 16 : index
    %c0_8 = arith.constant 0 : index
    %15 = vector.load %arg7[%c16, %c0_8] : memref<72x512xf32, #tpu.memory_space<vmem>>, vector<8x512xf32>
    tpu.vector_store %arg7[%c16, %c0_8], %14 {strides = array<i32>} : memref<72x512xf32, #tpu.memory_space<vmem>>, vector<8x512xf32>,
    %c1_i32 = arith.constant 1 : i32
    %16 = tpu.dynamic_rotate %0 by %c1_i32 dim 1 : vector<8x512xf32>, i32 -> vector<8x512xf32>
    %c3 = arith.constant 3 : index
    %c0_9 = arith.constant 0 : index
    %17 = vector.load %arg2[%c3, %c0_9] : memref<16x512xf32, #tpu.memory_space<vmem>>, vector<1x512xf32>
    %18 = vector.broadcast %17 : vector<1x512xf32> to vector<8x512xf32>
    %19 = arith.mulf %16, %18 : vector<8x512xf32>
    %c24 = arith.constant 24 : index
    %c0_10 = arith.constant 0 : index
    %20 = vector.load %arg7[%c24, %c0_10] : memref<72x512xf32, #tpu.memory_space<vmem>>, vector<8x512xf32>
    tpu.vector_store %arg7[%c24, %c0_10], %19 {strides = array<i32>} : memref<72x512xf32, #tpu.memory_space<vmem>>, vector<8x512xf32>,
    %c4 = arith.constant 4 : index
    %c0_11 = arith.constant 0 : index
    %21 = vector.load %arg2[%c4, %c0_11] : memref<16x512xf32, #tpu.memory_space<vmem>>, vector<1x512xf32>
    %22 = vector.broadcast %21 : vector<1x512xf32> to vector<8x512xf32>
    %23 = arith.mulf %0, %22 : vector<8x512xf32>
    %c32 = arith.constant 32 : index
    %c0_12 = arith.constant 0 : index
    %24 = vector.load %arg7[%c32, %c0_12] : memref<72x512xf32, #tpu.memory_space<vmem>>, vector<8x512xf32>
    tpu.vector_store %arg7[%c32, %c0_12], %23 {strides = array<i32>} : memref<72x512xf32, #tpu.memory_space<vmem>>, vector<8x512xf32>,
    %c511_i32 = arith.constant 511 : i32
    %25 = tpu.dynamic_rotate %0 by %c511_i32 dim 1 : vector<8x512xf32>, i32 -> vector<8x512xf32>
    %c5 = arith.constant 5 : index
    %c0_13 = arith.constant 0 : index
    %26 = vector.load %arg2[%c5, %c0_13] : memref<16x512xf32, #tpu.memory_space<vmem>>, vector<1x512xf32>
    %27 = vector.broadcast %26 : vector<1x512xf32> to vector<8x512xf32>
    %28 = arith.mulf %25, %27 : vector<8x512xf32>
    %c40 = arith.constant 40 : index
    %c0_14 = arith.constant 0 : index
    %29 = vector.load %arg7[%c40, %c0_14] : memref<72x512xf32, #tpu.memory_space<vmem>>, vector<8x512xf32>
    tpu.vector_store %arg7[%c40, %c0_14], %28 {strides = array<i32>} : memref<72x512xf32, #tpu.memory_space<vmem>>, vector<8x512xf32>,
    %c497_i32 = arith.constant 497 : i32
    %30 = tpu.dynamic_rotate %0 by %c497_i32 dim 1 : vector<8x512xf32>, i32 -> vector<8x512xf32>
    %c6 = arith.constant 6 : index
    %c0_15 = arith.constant 0 : index
    %31 = vector.load %arg2[%c6, %c0_15] : memref<16x512xf32, #tpu.memory_space<vmem>>, vector<1x512xf32>
    %32 = vector.broadcast %31 : vector<1x512xf32> to vector<8x512xf32>
    %33 = arith.mulf %30, %32 : vector<8x512xf32>
    %c48 = arith.constant 48 : index
    %c0_16 = arith.constant 0 : index
    %34 = vector.load %arg7[%c48, %c0_16] : memref<72x512xf32, #tpu.memory_space<vmem>>, vector<8x512xf32>
    tpu.vector_store %arg7[%c48, %c0_16], %33 {strides = array<i32>} : memref<72x512xf32, #tpu.memory_space<vmem>>, vector<8x512xf32>,
    %c496_i32 = arith.constant 496 : i32
    %35 = tpu.dynamic_rotate %0 by %c496_i32 dim 1 : vector<8x512xf32>, i32 -> vector<8x512xf32>
    %c7 = arith.constant 7 : index
    %c0_17 = arith.constant 0 : index
    %36 = vector.load %arg2[%c7, %c0_17] : memref<16x512xf32, #tpu.memory_space<vmem>>, vector<1x512xf32>
    %37 = vector.broadcast %36 : vector<1x512xf32> to vector<8x512xf32>
    %38 = arith.mulf %35, %37 : vector<8x512xf32>
    %c56 = arith.constant 56 : index
    %c0_18 = arith.constant 0 : index
    %39 = vector.load %arg7[%c56, %c0_18] : memref<72x512xf32, #tpu.memory_space<vmem>>, vector<8x512xf32>
    tpu.vector_store %arg7[%c56, %c0_18], %38 {strides = array<i32>} : memref<72x512xf32, #tpu.memory_space<vmem>>, vector<8x512xf32>,
    %c495_i32 = arith.constant 495 : i32
    %40 = tpu.dynamic_rotate %0 by %c495_i32 dim 1 : vector<8x512xf32>, i32 -> vector<8x512xf32>
    %c8_19 = arith.constant 8 : index
    %c0_20 = arith.constant 0 : index
    %41 = vector.load %arg2[%c8_19, %c0_20] : memref<16x512xf32, #tpu.memory_space<vmem>>, vector<1x512xf32>
    %42 = vector.broadcast %41 : vector<1x512xf32> to vector<8x512xf32>
    %43 = arith.mulf %40, %42 : vector<8x512xf32>
    %c64 = arith.constant 64 : index
    %c0_21 = arith.constant 0 : index
    %44 = vector.load %arg7[%c64, %c0_21] : memref<72x512xf32, #tpu.memory_space<vmem>>, vector<8x512xf32>
    tpu.vector_store %arg7[%c64, %c0_21], %43 {strides = array<i32>} : memref<72x512xf32, #tpu.memory_space<vmem>>, vector<8x512xf32>,
    %c0_22 = arith.constant 0 : index
    %c0_23 = arith.constant 0 : index
    %45 = vector.load %arg3[%c0_22, %c0_23] : memref<8x72xf32, #tpu.memory_space<vmem>>, vector<8x72xf32>
    %c0_24 = arith.constant 0 : index
    %c0_25 = arith.constant 0 : index
    %46 = vector.load %arg7[%c0_24, %c0_25] : memref<72x512xf32, #tpu.memory_space<vmem>>, vector<72x512xf32>
    %cst = arith.constant dense<0.000000e+00> : vector<8x512xf32>
    %47 = tpu.matmul %45, %46, %cst {dimension_numbers = #tpu.dot_dimension_numbers<[1], [0], [0], [1], [0, 0, 1, 1], [], []>} : vector<8x72xf32>, vector<72x512xf32>, vector<8x512xf32> -> vector<8x512xf32>
    %c0_26 = arith.constant 0 : index
    %c0_27 = arith.constant 0 : index
    %48 = vector.load %arg5[%c0_26, %c0_27] : memref<8x4xf32, #tpu.memory_space<vmem>>, vector<8x1xf32>
    %c0_28 = arith.constant 0 : index
    %c1_29 = arith.constant 1 : index
    %49 = vector.load %arg5[%c0_28, %c1_29] : memref<8x4xf32, #tpu.memory_space<vmem>>, vector<8x1xf32>
    %cst_30 = arith.constant dense<0.000000e+00> : vector<8xf32>
    %50 = vector.multi_reduction <add>, %47, %cst_30 [1] : vector<8x512xf32> to vector<8xf32>
    %51 = vector.shape_cast %50 : vector<8xf32> to vector<8x1xf32>
    %cst_31 = arith.constant 0.001953125 : f32
    %52 = vector.broadcast %cst_31 : f32 to vector<8x1xf32>
    %53 = arith.mulf %51, %52 : vector<8x1xf32>
    %54 = arith.mulf %47, %47 : vector<8x512xf32>
    %cst_32 = arith.constant dense<0.000000e+00> : vector<8xf32>
    %55 = vector.multi_reduction <add>, %54, %cst_32 [1] : vector<8x512xf32> to vector<8xf32>
    %56 = vector.shape_cast %55 : vector<8xf32> to vector<8x1xf32>
    %cst_33 = arith.constant 0.001953125 : f32
    %57 = vector.broadcast %cst_33 : f32 to vector<8x1xf32>
    %58 = arith.mulf %56, %57 : vector<8x1xf32>
    %59 = arith.mulf %53, %53 : vector<8x1xf32>
    %60 = arith.subf %58, %59 : vector<8x1xf32>
    %cst_34 = arith.constant 0.000000e+00 : f32
    %61 = vector.broadcast %cst_34 : f32 to vector<8x1xf32>
    %62 = arith.maximumf %60, %61 : vector<8x1xf32>
    %cst_35 = arith.constant 9.99999974E-6 : f32
    %63 = vector.broadcast %cst_35 : f32 to vector<8x1xf32>
    %64 = arith.addf %62, %63 : vector<8x1xf32>
    %65 = math.rsqrt %64 : vector<8x1xf32>
    %66 = arith.mulf %48, %65 : vector<8x1xf32>
    %67 = arith.mulf %53, %66 : vector<8x1xf32>
    %68 = arith.subf %49, %67 : vector<8x1xf32>
    %69 = vector.broadcast %66 : vector<8x1xf32> to vector<8x512xf32>
    %70 = arith.mulf %47, %69 : vector<8x512xf32>
    %71 = vector.broadcast %68 : vector<8x1xf32> to vector<8x512xf32>
    %72 = arith.addf %70, %71 : vector<8x512xf32>
    %cst_36 = arith.constant 0.000000e+00 : f32
    %73 = vector.broadcast %cst_36 : f32 to vector<8x512xf32>
    %74 = arith.maximumf %72, %73 : vector<8x512xf32>
    %c17_i32_37 = arith.constant 17 : i32
    %75 = tpu.dynamic_rotate %74 by %c17_i32_37 dim 1 : vector<8x512xf32>, i32 -> vector<8x512xf32>
    %c0_38 = arith.constant 0 : index
    %c0_39 = arith.constant 0 : index
    %76 = vector.load %arg2[%c0_38, %c0_39] : memref<16x512xf32, #tpu.memory_space<vmem>>, vector<1x512xf32>
    %77 = vector.broadcast %76 : vector<1x512xf32> to vector<8x512xf32>
    %78 = arith.mulf %75, %77 : vector<8x512xf32>
    %c0_40 = arith.constant 0 : index
    %c0_41 = arith.constant 0 : index
    %79 = vector.load %arg7[%c0_40, %c0_41] : memref<72x512xf32, #tpu.memory_space<vmem>>, vector<8x512xf32>
    tpu.vector_store %arg7[%c0_40, %c0_41], %78 {strides = array<i32>} : memref<72x512xf32, #tpu.memory_space<vmem>>, vector<8x512xf32>,
    %c16_i32_42 = arith.constant 16 : i32
    %80 = tpu.dynamic_rotate %74 by %c16_i32_42 dim 1 : vector<8x512xf32>, i32 -> vector<8x512xf32>
    %c1_43 = arith.constant 1 : index
    %c0_44 = arith.constant 0 : index
    %81 = vector.load %arg2[%c1_43, %c0_44] : memref<16x512xf32, #tpu.memory_space<vmem>>, vector<1x512xf32>
    %82 = vector.broadcast %81 : vector<1x512xf32> to vector<8x512xf32>
    %83 = arith.mulf %80, %82 : vector<8x512xf32>
    %c8_45 = arith.constant 8 : index
    %c0_46 = arith.constant 0 : index
    %84 = vector.load %arg7[%c8_45, %c0_46] : memref<72x512xf32, #tpu.memory_space<vmem>>, vector<8x512xf32>
    tpu.vector_store %arg7[%c8_45, %c0_46], %83 {strides = array<i32>} : memref<72x512xf32, #tpu.memory_space<vmem>>, vector<8x512xf32>,
    %c15_i32_47 = arith.constant 15 : i32
    %85 = tpu.dynamic_rotate %74 by %c15_i32_47 dim 1 : vector<8x512xf32>, i32 -> vector<8x512xf32>
    %c2_48 = arith.constant 2 : index
    %c0_49 = arith.constant 0 : index
    %86 = vector.load %arg2[%c2_48, %c0_49] : memref<16x512xf32, #tpu.memory_space<vmem>>, vector<1x512xf32>
    %87 = vector.broadcast %86 : vector<1x512xf32> to vector<8x512xf32>
    %88 = arith.mulf %85, %87 : vector<8x512xf32>
    %c16_50 = arith.constant 16 : index
    %c0_51 = arith.constant 0 : index
    %89 = vector.load %arg7[%c16_50, %c0_51] : memref<72x512xf32, #tpu.memory_space<vmem>>, vector<8x512xf32>
    tpu.vector_store %arg7[%c16_50, %c0_51], %88 {strides = array<i32>} : memref<72x512xf32, #tpu.memory_space<vmem>>, vector<8x512xf32>,
    %c1_i32_52 = arith.constant 1 : i32
    %90 = tpu.dynamic_rotate %74 by %c1_i32_52 dim 1 : vector<8x512xf32>, i32 -> vector<8x512xf32>
    %c3_53 = arith.constant 3 : index
    %c0_54 = arith.constant 0 : index
    %91 = vector.load %arg2[%c3_53, %c0_54] : memref<16x512xf32, #tpu.memory_space<vmem>>, vector<1x512xf32>
    %92 = vector.broadcast %91 : vector<1x512xf32> to vector<8x512xf32>
    %93 = arith.mulf %90, %92 : vector<8x512xf32>
    %c24_55 = arith.constant 24 : index
    %c0_56 = arith.constant 0 : index
    %94 = vector.load %arg7[%c24_55, %c0_56] : memref<72x512xf32, #tpu.memory_space<vmem>>, vector<8x512xf32>
    tpu.vector_store %arg7[%c24_55, %c0_56], %93 {strides = array<i32>} : memref<72x512xf32, #tpu.memory_space<vmem>>, vector<8x512xf32>,
    %c4_57 = arith.constant 4 : index
    %c0_58 = arith.constant 0 : index
    %95 = vector.load %arg2[%c4_57, %c0_58] : memref<16x512xf32, #tpu.memory_space<vmem>>, vector<1x512xf32>
    %96 = vector.broadcast %95 : vector<1x512xf32> to vector<8x512xf32>
    %97 = arith.mulf %74, %96 : vector<8x512xf32>
    %c32_59 = arith.constant 32 : index
    %c0_60 = arith.constant 0 : index
    %98 = vector.load %arg7[%c32_59, %c0_60] : memref<72x512xf32, #tpu.memory_space<vmem>>, vector<8x512xf32>
    tpu.vector_store %arg7[%c32_59, %c0_60], %97 {strides = array<i32>} : memref<72x512xf32, #tpu.memory_space<vmem>>, vector<8x512xf32>,
    %c511_i32_61 = arith.constant 511 : i32
    %99 = tpu.dynamic_rotate %74 by %c511_i32_61 dim 1 : vector<8x512xf32>, i32 -> vector<8x512xf32>
    %c5_62 = arith.constant 5 : index
    %c0_63 = arith.constant 0 : index
    %100 = vector.load %arg2[%c5_62, %c0_63] : memref<16x512xf32, #tpu.memory_space<vmem>>, vector<1x512xf32>
    %101 = vector.broadcast %100 : vector<1x512xf32> to vector<8x512xf32>
    %102 = arith.mulf %99, %101 : vector<8x512xf32>
    %c40_64 = arith.constant 40 : index
    %c0_65 = arith.constant 0 : index
    %103 = vector.load %arg7[%c40_64, %c0_65] : memref<72x512xf32, #tpu.memory_space<vmem>>, vector<8x512xf32>
    tpu.vector_store %arg7[%c40_64, %c0_65], %102 {strides = array<i32>} : memref<72x512xf32, #tpu.memory_space<vmem>>, vector<8x512xf32>,
    %c497_i32_66 = arith.constant 497 : i32
    %104 = tpu.dynamic_rotate %74 by %c497_i32_66 dim 1 : vector<8x512xf32>, i32 -> vector<8x512xf32>
    %c6_67 = arith.constant 6 : index
    %c0_68 = arith.constant 0 : index
    %105 = vector.load %arg2[%c6_67, %c0_68] : memref<16x512xf32, #tpu.memory_space<vmem>>, vector<1x512xf32>
    %106 = vector.broadcast %105 : vector<1x512xf32> to vector<8x512xf32>
    %107 = arith.mulf %104, %106 : vector<8x512xf32>
    %c48_69 = arith.constant 48 : index
    %c0_70 = arith.constant 0 : index
    %108 = vector.load %arg7[%c48_69, %c0_70] : memref<72x512xf32, #tpu.memory_space<vmem>>, vector<8x512xf32>
    tpu.vector_store %arg7[%c48_69, %c0_70], %107 {strides = array<i32>} : memref<72x512xf32, #tpu.memory_space<vmem>>, vector<8x512xf32>,
    %c496_i32_71 = arith.constant 496 : i32
    %109 = tpu.dynamic_rotate %74 by %c496_i32_71 dim 1 : vector<8x512xf32>, i32 -> vector<8x512xf32>
    %c7_72 = arith.constant 7 : index
    %c0_73 = arith.constant 0 : index
    %110 = vector.load %arg2[%c7_72, %c0_73] : memref<16x512xf32, #tpu.memory_space<vmem>>, vector<1x512xf32>
    %111 = vector.broadcast %110 : vector<1x512xf32> to vector<8x512xf32>
    %112 = arith.mulf %109, %111 : vector<8x512xf32>
    %c56_74 = arith.constant 56 : index
    %c0_75 = arith.constant 0 : index
    %113 = vector.load %arg7[%c56_74, %c0_75] : memref<72x512xf32, #tpu.memory_space<vmem>>, vector<8x512xf32>
    tpu.vector_store %arg7[%c56_74, %c0_75], %112 {strides = array<i32>} : memref<72x512xf32, #tpu.memory_space<vmem>>, vector<8x512xf32>,
    %c495_i32_76 = arith.constant 495 : i32
    %114 = tpu.dynamic_rotate %74 by %c495_i32_76 dim 1 : vector<8x512xf32>, i32 -> vector<8x512xf32>
    %c8_77 = arith.constant 8 : index
    %c0_78 = arith.constant 0 : index
    %115 = vector.load %arg2[%c8_77, %c0_78] : memref<16x512xf32, #tpu.memory_space<vmem>>, vector<1x512xf32>
    %116 = vector.broadcast %115 : vector<1x512xf32> to vector<8x512xf32>
    %117 = arith.mulf %114, %116 : vector<8x512xf32>
    %c64_79 = arith.constant 64 : index
    %c0_80 = arith.constant 0 : index
    %118 = vector.load %arg7[%c64_79, %c0_80] : memref<72x512xf32, #tpu.memory_space<vmem>>, vector<8x512xf32>
    tpu.vector_store %arg7[%c64_79, %c0_80], %117 {strides = array<i32>} : memref<72x512xf32, #tpu.memory_space<vmem>>, vector<8x512xf32>,
    %c0_81 = arith.constant 0 : index
    %c0_82 = arith.constant 0 : index
    %119 = vector.load %arg4[%c0_81, %c0_82] : memref<8x72xf32, #tpu.memory_space<vmem>>, vector<8x72xf32>
    %c0_83 = arith.constant 0 : index
    %c0_84 = arith.constant 0 : index
    %120 = vector.load %arg7[%c0_83, %c0_84] : memref<72x512xf32, #tpu.memory_space<vmem>>, vector<72x512xf32>
    %cst_85 = arith.constant dense<0.000000e+00> : vector<8x512xf32>
    %121 = tpu.matmul %119, %120, %cst_85 {dimension_numbers = #tpu.dot_dimension_numbers<[1], [0], [0], [1], [0, 0, 1, 1], [], []>} : vector<8x72xf32>, vector<72x512xf32>, vector<8x512xf32> -> vector<8x512xf32>
    %c0_86 = arith.constant 0 : index
    %c2_87 = arith.constant 2 : index
    %122 = vector.load %arg5[%c0_86, %c2_87] : memref<8x4xf32, #tpu.memory_space<vmem>>, vector<8x1xf32>
    %c0_88 = arith.constant 0 : index
    %c3_89 = arith.constant 3 : index
    %123 = vector.load %arg5[%c0_88, %c3_89] : memref<8x4xf32, #tpu.memory_space<vmem>>, vector<8x1xf32>
    %cst_90 = arith.constant dense<0.000000e+00> : vector<8xf32>
    %124 = vector.multi_reduction <add>, %121, %cst_90 [1] : vector<8x512xf32> to vector<8xf32>
    %125 = vector.shape_cast %124 : vector<8xf32> to vector<8x1xf32>
    %cst_91 = arith.constant 0.001953125 : f32
    %126 = vector.broadcast %cst_91 : f32 to vector<8x1xf32>
    %127 = arith.mulf %125, %126 : vector<8x1xf32>
    %128 = arith.mulf %121, %121 : vector<8x512xf32>
    %cst_92 = arith.constant dense<0.000000e+00> : vector<8xf32>
    %129 = vector.multi_reduction <add>, %128, %cst_92 [1] : vector<8x512xf32> to vector<8xf32>
    %130 = vector.shape_cast %129 : vector<8xf32> to vector<8x1xf32>
    %cst_93 = arith.constant 0.001953125 : f32
    %131 = vector.broadcast %cst_93 : f32 to vector<8x1xf32>
    %132 = arith.mulf %130, %131 : vector<8x1xf32>
    %133 = arith.mulf %127, %127 : vector<8x1xf32>
    %134 = arith.subf %132, %133 : vector<8x1xf32>
    %cst_94 = arith.constant 0.000000e+00 : f32
    %135 = vector.broadcast %cst_94 : f32 to vector<8x1xf32>
    %136 = arith.maximumf %134, %135 : vector<8x1xf32>
    %cst_95 = arith.constant 9.99999974E-6 : f32
    %137 = vector.broadcast %cst_95 : f32 to vector<8x1xf32>
    %138 = arith.addf %136, %137 : vector<8x1xf32>
    %139 = math.rsqrt %138 : vector<8x1xf32>
    %140 = arith.mulf %122, %139 : vector<8x1xf32>
    %141 = arith.mulf %127, %140 : vector<8x1xf32>
    %142 = arith.subf %123, %141 : vector<8x1xf32>
    %143 = vector.broadcast %140 : vector<8x1xf32> to vector<8x512xf32>
    %144 = arith.mulf %121, %143 : vector<8x512xf32>
    %145 = vector.broadcast %142 : vector<8x1xf32> to vector<8x512xf32>
    %146 = arith.addf %144, %145 : vector<8x512xf32>
    %cst_96 = arith.constant 0.000000e+00 : f32
    %147 = vector.broadcast %cst_96 : f32 to vector<8x512xf32>
    %148 = arith.maximumf %146, %147 : vector<8x512xf32>
    %c0_97 = arith.constant 0 : index
    %c0_98 = arith.constant 0 : index
    %149 = vector.load %arg6[%c0_97, %c0_98] : memref<8x512xf32, #tpu.memory_space<vmem>>, vector<8x512xf32>
    tpu.vector_store %arg6[%c0_97, %c0_98], %148 {strides = array<i32>} : memref<8x512xf32, #tpu.memory_space<vmem>>, vector<8x512xf32>,
    return
  }
  func.func @transform_0(%arg0: i32) -> (i32, i32) {
    %c0_i32 = arith.constant 0 : i32
    %c0_i32_0 = arith.constant 0 : i32
    %c0_i32_1 = arith.constant 0 : i32
    return %c0_i32, %c0_i32_0 : i32, i32
  }
  func.func @transform_1(%arg0: i32) -> (i32, i32) {
    %c0_i32 = arith.constant 0 : i32
    %c0_i32_0 = arith.constant 0 : i32
    %c0_i32_1 = arith.constant 0 : i32
    return %c0_i32, %c0_i32_0 : i32, i32
  }
  func.func @transform_2(%arg0: i32) -> (i32, i32) {
    %c0_i32 = arith.constant 0 : i32
    %c0_i32_0 = arith.constant 0 : i32
    %c0_i32_1 = arith.constant 0 : i32
    return %c0_i32, %c0_i32_0 : i32, i32
  }
  func.func @transform_3(%arg0: i32) -> (i32, i32) {
    %c0_i32 = arith.constant 0 : i32
    %c0_i32_0 = arith.constant 0 : i32
    %c0_i32_1 = arith.constant 0 : i32
    return %c0_i32, %c0_i32_0 : i32, i32
  }
  func.func @transform_4(%arg0: i32) -> (i32, i32) {
    %c0_i32 = arith.constant 0 : i32
    %c0_i32_0 = arith.constant 0 : i32
    %c0_i32_1 = arith.constant 0 : i32
    return %c0_i32, %c0_i32_0 : i32, i32
  }
  func.func @transform_5(%arg0: i32) -> (i32, i32) {
    %c0_i32 = arith.constant 0 : i32
    %c0_i32_0 = arith.constant 0 : i32
    %c0_i32_1 = arith.constant 0 : i32
    return %c0_i32, %c0_i32_0 : i32, i32
  }
}

</mosaic_0001>

<bundles_post_ra>
// kernel: conv_block_forward.1
= control target key start
LH: loop header
LB: loop body
LE: loop exit
PB: predicated region body
PF: predicated region fallthrough
CT: control target
= control target key end

     0   :  { %s972_s22 = smov 112   ;;  %s973_s23 = smov 111   ;;  %v32_v6 = vlaneseq  ;;  %vm337_vm8 = vcmask 588800   ;;  %s1475_s0 = inlined_call_operand.vmem [shape: f32[8,512], index: 0, kind: input, shape index: {}]   ;;  %s1476_s1 = inlined_call_operand.vmem [shape: f32[16,512], index: 1, kind: input, shape index: {}]   ;;  %s1477_s2 = inlined_call_operand.vmem [shape: f32[8,72], index: 2, kind: input, shape index: {}]   ;;  %s1478_s4 = inlined_call_operand.vmem [shape: f32[8,4], index: 4, kind: input, shape index: {}]   ;;  %s1479_s3 = inlined_call_operand.vmem [shape: f32[8,72], index: 3, kind: input, shape index: {}]   ;;  %s1480_s5 = inlined_call_operand.vmem [shape: f32[8,512], index: 5, kind: output, shape index: {}]  }
   0x1   :  { %v1017_v0 = vld [vmem:[%s1475_s0 + $0x10] sm:$0xff]  ;;  %v1022_v1 = vld [vmem:[%s1475_s0] sm:$0xff]  ;;  %v1033_v2 = vld [vmem:[%s1475_s0 + $0x18] sm:$0xff]  ;;  %s974_s26 = smov 113   ;;  %s975_s29 = smov 127  }
   0x2   :  { %240 = vrot.lane.b32.xlu1 %v1017_v0, %s972_s22  ;;  %272 = vrot.lane.b32.xlu0 %v1017_v0, %s973_s23  ;;  %v1044_v3 = vld [vmem:[%s1475_s0 + $0x8] sm:$0xff]  ;;  %s976_s0 = smov 1   ;;  %s977_s30 = smov 15   ;;  %v1100_v7 = vand.u32 127, %v32_v6 }
   0x3   :  { %268 = vrot.lane.b32.xlu2 %v1022_v1, %s973_s23  ;;  %s978_s6 = smov 16   ;;  %s979_s7 = smov 17   ;;  %v934_v8 = vld [vmem:[%s1476_s1 + $0x20] ss:$8 sm:$0xf] }
   0x4   :  { %v284_v9 = vperm.slane %v934_v8, 0  ;;  %vm276_vm0 = vcmp.lt.s32.totalorder %v1100_v7, 111  ;;  %v285_v13 = vperm.slane %v934_v8, 1  ;;  %v1115_v18 = vld [vmem:[%s1476_s1 + $0x7] ss:$8 sm:$0xf] }
   0x5   :  { %vm244_vm1 = vcmp.lt.s32.totalorder %v1100_v7, 112  ;;  %v286_v19 = vperm.slane %v934_v8, 2  ;;  %v287_v20 = vperm.slane %v934_v8, 3  ;;  %v254_v24 = vperm.slane %v1115_v18, 2 }
   0x6   :  { %v932_v30 = vld [vmem:[%s1476_s1 + $0x6] ss:$8 sm:$0xf]  ;;  %vm212_vm2 = vcmp.lt.s32.totalorder %v1100_v7, 113  ;;  %v255_v33 = vperm.slane %v1115_v18, 3  ;;  %vm180_vm3 = vcmp.lt.s32.totalorder %v1100_v7, 127 }
   0x7   :  { %v222_v32 = vperm.slane %v932_v30, 2  ;;  %v223_v36 = vperm.slane %v932_v30, 3  ;;  %v931_v43 = vld [vmem:[%s1476_s1 + $0x5] ss:$8 sm:$0xf]  ;;  %v252_v54 = vperm.slane %v1115_v18, 0 }
   0x8   :  { %v930_v44 = vld [vmem:[%s1476_s1 + $0x4] ss:$8 sm:$0xf]  ;;  %v190_v46 = vperm.slane %v931_v43, 2  ;;  %v253_v55 = vperm.slane %v1115_v18, 1  ;;  %v191_v56 = vperm.slane %v931_v43, 3 }
   0x9   :  { %v158_v47 = vperm.slane %v930_v44, 2  ;;  %v220_v57 = vperm.slane %v932_v30, 0  ;;  %v221_v58 = vperm.slane %v932_v30, 1  ;;  %v189_v59 = vperm.slane %v931_v43, 1 }
   0xa   :  { %242 = vrot.lane.b32.xlu1 %v1033_v2, %s972_s22  ;;  %274 = vrot.lane.b32.xlu0 %v1033_v2, %s973_s23  ;;  %v159_v60 = vperm.slane %v930_v44, 3  ;;  %v188_v6 = vperm.slane %v931_v43, 0  ;;  %vm129_vm4 = vcmp.lt.s32.totalorder %v1100_v7, 1  ;;  %vm97_vm5 = vcmp.lt.s32.totalorder %v1100_v7, 15 }
   0xb   :  { %208 = vrot.lane.b32.xlu2 %v1017_v0, %s974_s26  ;;  %v166_v52 = vmul.f32 %v158_v47, %v1017_v0  ;;  %vm65_vm6 = vcmp.lt.s32.totalorder %v1100_v7, 16  ;;  %vm34_vm7 = vcmp.lt.s32.totalorder %v1100_v7, 17 }
  0x12   :  { %210 = vrot.lane.b32.xlu0 %v1033_v2, %s974_s26  ;;  %236 = vrot.lane.b32.xlu1 %v1022_v1, %s972_s22 }
  0x13   :  { %270 = vrot.lane.b32.xlu2 %v1044_v3, %s973_s23 }
  0x1a   :  { %176 = vrot.lane.b32.xlu0 %v1017_v0, %s975_s29  ;;  %178 = vrot.lane.b32.xlu1 %v1033_v2, %s975_s29 }
  0x1b   :  { %204 = vrot.lane.b32.xlu2 %v1022_v1, %s974_s26 }
  0x22   :  { %238 = vrot.lane.b32.xlu0 %v1044_v3, %s972_s22  ;;  %172 = vrot.lane.b32.xlu1 %v1022_v1, %s975_s29 }
  0x23   :  { %206 = vrot.lane.b32.xlu2 %v1044_v3, %s974_s26 }
  0x2a   :  { %123 = vrot.lane.b32.xlu0 %v1044_v3, %s976_s0  ;;  %125 = vrot.lane.b32.xlu1 %v1017_v0, %s976_s0 }
  0x2b   :  { %174 = vrot.lane.b32.xlu2 %v1044_v3, %s975_s29 }
  0x32   :  { %91 = vrot.lane.b32.xlu0 %v1044_v3, %s977_s30  ;;  %93 = vrot.lane.b32.xlu1 %v1017_v0, %s977_s30 }
  0x33   :  { %127 = vrot.lane.b32.xlu2 %v1033_v2, %s976_s0 }
  0x3a   :  { %59 = vrot.lane.b32.xlu0 %v1044_v3, %s978_s6  ;;  %61 = vrot.lane.b32.xlu1 %v1017_v0, %s978_s6 }
  0x3b   :  { %95 = vrot.lane.b32.xlu2 %v1033_v2, %s977_s30 }
  0x42   :  { %121 = vrot.lane.b32.xlu0 %v1022_v1, %s976_s0  ;;  %26 = vrot.lane.b32.xlu1 %v1044_v3, %s979_s7 }
  0x43   :  { %28 = vrot.lane.b32.xlu2 %v1017_v0, %s979_s7 }
  0x4a   :  { %63 = vrot.lane.b32.xlu0 %v1033_v2, %s978_s6  ;;  %89 = vrot.lane.b32.xlu1 %v1022_v1, %s977_s30 }
  0x4b   :  { %30 = vrot.lane.b32.xlu2 %v1033_v2, %s979_s7 }
  0x52   :  { %57 = vrot.lane.b32.xlu0 %v1022_v1, %s978_s6  ;;  %24 = vrot.lane.b32.xlu1 %v1022_v1, %s979_s7 }
  0x5d   :  { %v269_v4 = vpop.permute.xlu2 %268 }
  0x65   :  { %v1098_v5 = vpop.permute.xlu2 %208 }
  0x6d   :  { %v271_v10 = vpop.permute.xlu2 %270 }
  0x6e   :  { %v279_v11 = vsel %vm276_vm0, %v269_v4, %v271_v10 }
  0x6f   :  { %v292_v12 = vmul.f32 %v284_v9, %v279_v11 }
  0x71   :  { %348 = vmatpush.msra.mxu0 %v292_v12 }
  0x74   :  { %v1108_v14 = vpop.permute.xlu1 %240  ;;  %v273_v15 = vpop.permute.xlu0 %272 }
  0x75   :  { %v278_v16 = vsel %vm276_vm0, %v271_v10, %v273_v15  ;;  %v205_v21 = vpop.permute.xlu2 %204 }
  0x76   :  { %v293_v17 = vmul.f32 %v285_v13, %v278_v16  ;;  %v157_v16 = vperm.slane %v930_v44, 1 }
  0x78   :  { %368 = vmatpush.msra.mxu1 %v293_v17 }
  0x7c   :  { %v243_v22 = vpop.permute.xlu1 %242  ;;  %v275_v23 = vpop.permute.xlu0 %274 }
  0x7d   :  { %v245_v25 = vsel %vm244_vm1, %v1108_v14, %v243_v22  ;;  %v277_v26 = vsel %vm276_vm0, %v273_v15, %v275_v23  ;;  %v280_v27 = vsel %vm276_vm0, %v275_v23, %v269_v4  ;;  %v207_v40 = vpop.permute.xlu2 %206  ;;  %v1167_v15 = vld [vmem:[%s1476_s1 + $0x3] ss:$8 sm:$0xf] }
  0x7e   :  { %v294_v28 = vmul.f32 %v286_v19, %v277_v26  ;;  %v295_v29 = vmul.f32 %v287_v20, %v280_v27  ;;  %v262_v31 = vmul.f32 %v254_v24, %v245_v25  ;;  %v214_v61 = vsel %vm212_vm2, %v207_v40, %v1098_v5 }
  0x7f   :  { %v215_v62 = vsel %vm212_vm2, %v205_v21, %v207_v40  ;;  %v229_v19 = vmul.f32 %v221_v58, %v214_v61  ;;  %v140_v24 = vperm.slane %v1167_v15, 3  ;;  %v1192_v40 = vld [vmem:[%s1476_s1 + $0x1] ss:$8 sm:$0xf] }
  0x80   :  { %388 = vmatpush.msra.mxu2 %v294_v28  ;;  %408 = vmatpush.msra.mxu3 %v295_v29  ;;  %v228_v18 = vmul.f32 %v220_v57, %v215_v62  ;;  %v76_v62 = vperm.slane %v1192_v40, 3 }
  0x82   :  { %389 = vmatpush.msra.mxu2 %v262_v31 }
  0x84   :  { %v211_v34 = vpop.permute.xlu0 %210  ;;  %v237_v35 = vpop.permute.xlu1 %236 }
  0x85   :  { %v213_v37 = vsel %vm212_vm2, %v1098_v5, %v211_v34  ;;  %v216_v38 = vsel %vm212_vm2, %v211_v34, %v205_v21  ;;  %v248_v39 = vsel %vm244_vm1, %v243_v22, %v237_v35  ;;  %v175_v53 = vpop.permute.xlu2 %174  ;;  %v156_v5 = vperm.slane %v930_v44, 0 }
  0x86   :  { %v230_v41 = vmul.f32 %v222_v32, %v213_v37  ;;  %v263_v42 = vmul.f32 %v255_v33, %v248_v39  ;;  %v231_v45 = vmul.f32 %v223_v36, %v216_v38  ;;  %v139_v22 = vperm.slane %v1167_v15, 2 }
  0x87   :  { %v164_v25 = vmul.f32 %v156_v5, %v1022_v1  ;;  %v928_v1 = vld [vmem:[%s1476_s1 + $0x2] ss:$8 sm:$0xf] }
  0x88   :  { %390 = vmatpush.msra.mxu2 %v230_v41  ;;  %409 = vmatpush.msra.mxu3 %v263_v42  ;;  %v107_v32 = vperm.slane %v928_v1, 2  ;;  %v108_v33 = vperm.slane %v928_v1, 3  ;;  %v75_v41 = vperm.slane %v1192_v40, 2  ;;  %v106_v61 = vperm.slane %v928_v1, 1 }
  0x8a   :  { %410 = vmatpush.msra.mxu3 %v231_v45 }
  0x8c   :  { %v177_v48 = vpop.permute.xlu0 %176  ;;  %v179_v49 = vpop.permute.xlu1 %178 }
  0x8d   :  { %v181_v50 = vsel %vm180_vm3, %v177_v48, %v179_v49  ;;  %v182_v63 = vsel %vm180_vm3, %v175_v53, %v177_v48  ;;  %v128_v20 = vpop.permute.xlu2 %127  ;;  %v137_v48 = vperm.slane %v1167_v15, 0 }
  0x8e   :  { %v198_v51 = vmul.f32 %v190_v46, %v181_v50  ;;  %v197_v21 = vmul.f32 %v189_v59, %v182_v63  ;;  %v39_v46 = vld [vmem:[%s1476_s1] ss:$8 sm:$0xf] }
  0x8f   :  { %v43_v50 = vperm.slane %v39_v46, 2  ;;  %v300_v59 = vld [vmem:[%s1477_s2] sm:$0xff] }
  0x90   :  { %391 = vmatpush.msra.mxu2 %v198_v51 }
  0x92   :  { %392 = vmatpush.msra.mxu2 %v166_v52 }
  0x94   :  { %v239_v0 = vpop.permute.xlu0 %238  ;;  %v173_v4 = vpop.permute.xlu1 %172 }
  0x95   :  { %v246_v8 = vsel %vm244_vm1, %v239_v0, %v1108_v14  ;;  %v247_v9 = vsel %vm244_vm1, %v237_v35, %v239_v0  ;;  %v184_v10 = vsel %vm180_vm3, %v179_v49, %v173_v4  ;;  %v183_v17 = vsel %vm180_vm3, %v173_v4, %v175_v53 }
  0x96   :  { %v260_v11 = vmul.f32 %v252_v54, %v247_v9  ;;  %v261_v12 = vmul.f32 %v253_v55, %v246_v8  ;;  %v199_v13 = vmul.f32 %v191_v56, %v184_v10  ;;  %v167_v14 = vmul.f32 %v159_v60, %v1033_v2 }
  0x97   :  { %v196_v23 = vmul.f32 %v188_v6, %v183_v17  ;;  %v165_v2 = vmul.f32 %v157_v16, %v1044_v3  ;;  %v96_v3 = vpop.permute.xlu2 %95  ;;  %v138_v49 = vperm.slane %v1167_v15, 1  ;;  %v105_v60 = vperm.slane %v928_v1, 0 }
  0x98   :  { %349 = vmatpush.msra.mxu0 %v260_v11  ;;  %369 = vmatpush.msra.mxu1 %v261_v12  ;;  %v44_v10 = vperm.slane %v39_v46, 3  ;;  %v73_v16 = vperm.slane %v1192_v40, 0  ;;  %v74_v17 = vperm.slane %v1192_v40, 1  ;;  %v980_v40 = vmov 0  }
  0x99   :  { %411 = vmatpush.msra.mxu3 %v199_v13  ;;  %963 = vset.pattern.permute.xlu1 %v980_v40 }
  0x9a   :  { %350 = vmatpush.msra.mxu0 %v228_v18  ;;  %370 = vmatpush.msra.mxu1 %v229_v19  ;;  %v41_v19 = vperm.slane %v39_v46, 0 }
  0x9b   :  { %412 = vmatpush.msra.mxu3 %v167_v14 }
  0x9c   :  { %v124_v26 = vpop.permute.xlu0 %123  ;;  %v126_v27 = vpop.permute.xlu1 %125  ;;  %351 = vmatpush.msra.mxu0 %v196_v23  ;;  %371 = vmatpush.msra.mxu1 %v197_v21 }
  0x9d   :  { %v131_v28 = vsel %vm129_vm4, %v124_v26, %v126_v27  ;;  %v130_v29 = vsel %vm129_vm4, %v126_v27, %v128_v20 }
  0x9e   :  { %v147_v30 = vmul.f32 %v139_v22, %v131_v28  ;;  %v148_v31 = vmul.f32 %v140_v24, %v130_v29  ;;  %352 = vmatpush.msra.mxu0 %v164_v25  ;;  %372 = vmatpush.msra.mxu1 %v165_v2 }
  0x9f   :  { %v29_v47 = vpop.permute.xlu2 %28 }
  0xa0   :  { %393 = vmatpush.msra.mxu2 %v147_v30  ;;  %413 = vmatpush.msra.mxu3 %v148_v31 }
  0xa4   :  { %v92_v34 = vpop.permute.xlu0 %91  ;;  %v94_v35 = vpop.permute.xlu1 %93 }
  0xa5   :  { %v99_v36 = vsel %vm97_vm5, %v92_v34, %v94_v35  ;;  %v98_v37 = vsel %vm97_vm5, %v94_v35, %v96_v3 }
  0xa6   :  { %v115_v38 = vmul.f32 %v107_v32, %v99_v36  ;;  %v116_v39 = vmul.f32 %v108_v33, %v98_v37 }
  0xa7   :  { %v31_v63 = vpop.permute.xlu2 %30 }
  0xa8   :  { %394 = vmatpush.msra.mxu2 %v115_v38  ;;  %414 = vmatpush.msra.mxu3 %v116_v39  ;;  %v35_v5 = vsel %vm34_vm7, %v29_v47, %v31_v63 }
  0xa9   :  { %v52_v15 = vmul.f32 %v44_v10, %v35_v5 }
  0xac   :  { %v60_v42 = vpop.permute.xlu0 %59  ;;  %v62_v43 = vpop.permute.xlu1 %61 }
  0xad   :  { %v67_v44 = vsel %vm65_vm6, %v60_v42, %v62_v43 }
  0xae   :  { %v83_v45 = vmul.f32 %v75_v41, %v67_v44 }
  0xb0   :  { %395 = vmatpush.msra.mxu2 %v83_v45 }
  0xb4   :  { %v122_v51 = vpop.permute.xlu0 %121  ;;  %v27_v52 = vpop.permute.xlu1 %26 }
  0xb5   :  { %v132_v53 = vsel %vm129_vm4, %v122_v51, %v124_v26  ;;  %v133_v54 = vsel %vm129_vm4, %v128_v20, %v122_v51  ;;  %v36_v55 = vsel %vm34_vm7, %v27_v52, %v29_v47  ;;  %v42_v20 = vperm.slane %v39_v46, 1 }
  0xb6   :  { %v145_v56 = vmul.f32 %v137_v48, %v133_v54  ;;  %v146_v57 = vmul.f32 %v138_v49, %v132_v53  ;;  %v51_v58 = vmul.f32 %v43_v50, %v36_v55  ;;  %v1239_v54 = vld [vmem:[%s1478_s4] sm:$0xff] }
  0xb8   :  { %353 = vmatpush.msra.mxu0 %v145_v56  ;;  %373 = vmatpush.msra.mxu1 %v146_v57 }
  0xb9   :  { %396 = vmatpush.msra.mxu2 %v51_v58 }
  0xba   :  { %937 = vmatmul.msk.f32.vlgmr.msra.gmra.mxu2 %vm337_vm8, %v300_v59 }
  0xbc   :  { %v64_v0 = vpop.permute.xlu0 %63  ;;  %v90_v4 = vpop.permute.xlu1 %89 }
  0xbd   :  { %v66_v6 = vsel %vm65_vm6, %v62_v43, %v64_v0  ;;  %v100_v8 = vsel %vm97_vm5, %v90_v4, %v92_v34  ;;  %v101_v9 = vsel %vm97_vm5, %v96_v3, %v90_v4 }
  0xbe   :  { %v113_v11 = vmul.f32 %v105_v60, %v101_v9  ;;  %v114_v12 = vmul.f32 %v106_v61, %v100_v8  ;;  %v84_v13 = vmul.f32 %v76_v62, %v66_v6 }
  0xc0   :  { %354 = vmatpush.msra.mxu0 %v113_v11  ;;  %374 = vmatpush.msra.mxu1 %v114_v12 }
  0xc1   :  { %415 = vmatpush.msra.mxu3 %v84_v13 }
  0xc3   :  { %416 = vmatpush.msra.mxu3 %v52_v15 }
  0xc4   :  { %v58_v14 = vpop.permute.xlu0 %57  ;;  %v25_v18 = vpop.permute.xlu1 %24  ;;  %938 = vmatmul.msk.f32.vlgmr.msra.gmra.mxu3 %vm337_vm8, %v300_v59 }
  0xc5   :  { %v68_v21 = vsel %vm65_vm6, %v58_v14, %v60_v42  ;;  %v69_v22 = vsel %vm65_vm6, %v64_v0, %v58_v14  ;;  %v37_v23 = vsel %vm34_vm7, %v25_v18, %v27_v52  ;;  %v38_v24 = vsel %vm34_vm7, %v31_v63, %v25_v18 }
  0xc6   :  { %v81_v25 = vmul.f32 %v73_v16, %v69_v22  ;;  %v82_v2 = vmul.f32 %v74_v17, %v68_v21  ;;  %v49_v26 = vmul.f32 %v41_v19, %v38_v24  ;;  %v50_v27 = vmul.f32 %v42_v20, %v37_v23  ;;  %v946_v19 = vld [vmem:[%s1476_s1 + $0x20] ss:$8 sm:$0xf] }
  0xc7   :  { %v725_v20 = vperm.slane %v946_v19, 2  ;;  %v726_v21 = vperm.slane %v946_v19, 3  ;;  %v723_v22 = vperm.slane %v946_v19, 0  ;;  %v724_v23 = vperm.slane %v946_v19, 1 }
  0xc8   :  { %355 = vmatpush.msra.mxu0 %v81_v25  ;;  %375 = vmatpush.msra.mxu1 %v82_v2 }
  0xca   :  { %356 = vmatpush.msra.mxu0 %v49_v26  ;;  %376 = vmatpush.msra.mxu1 %v50_v27 }
  0xcb   :  { %935 = vmatmul.msk.f32.vlgmr.msra.gmra.mxu0 %vm337_vm8, %v300_v59  ;;  %936 = vmatmul.msk.f32.vlgmr.msra.gmra.mxu1 %vm337_vm8, %v300_v59  ;;  %v981_v59 = vmov 1  }
 0x13d   :  { %v398_v28 = vpop.f32.mrf.mxu2 }
 0x13e   :  { %v430_v33 = vmul.f32 %v398_v28, %v398_v28 }
 0x147   :  { %v418_v29 = vpop.f32.mrf.mxu3 }
 0x148   :  { %v358_v30 = vpop.f32.mrf.mxu0  ;;  %v378_v31 = vpop.f32.mrf.mxu1  ;;  %v431_v35 = vmul.f32 %v418_v29, %v418_v29 }
 0x149   :  { %v428_v1 = vmul.f32 %v358_v30, %v358_v30  ;;  %v422_v3 = vadd.f32 %v378_v31, %v358_v30  ;;  %v429_v32 = vmul.f32 %v378_v31, %v378_v31 }
 0x14b   :  { %v423_v34 = vadd.f32 %v422_v3, %v398_v28  ;;  %v432_v36 = vadd.f32 %v429_v32, %v428_v1  ;;  %v1334_v32 = vld [vmem:[%s1476_s1 + $0x7] ss:$8 sm:$0xf] }
 0x14c   :  { %v693_v19 = vperm.slane %v1334_v32, 0 }
 0x14d   :  { %v424_v37 = vadd.f32 %v423_v34, %v418_v29  ;;  %v433_v38 = vadd.f32 %v432_v36, %v430_v33  ;;  %v695_v33 = vperm.slane %v1334_v32, 2  ;;  %v696_v34 = vperm.slane %v1334_v32, 3 }
 0x14f   :  { %425 = vadd.xlane.f32.xlu2 %v424_v37  ;;  %v434_v39 = vadd.f32 %v433_v38, %v431_v35 }
 0x151   :  { %435 = vadd.xlane.f32.xlu0 %v434_v39 }
 0x1c2   :  { %v426_v41 = vpop.xlane.xlu2 %425 }
 0x1c3   :  { %v427_v42 = vmul.f32 0.001953125, %v426_v41 }
 0x1c4   :  { %v436_v43 = vpop.xlane.xlu0 %435 }
 0x1c5   :  { %v438_v44 = vmul.f32 %v427_v42, %v427_v42  ;;  %v437_v45 = vmul.f32 0.001953125, %v436_v43 }
 0x1c7   :  { %v439_v46 = vsub.f32 %v437_v45, %v438_v44  ;;  %v944_v45 = vld [vmem:[%s1476_s1 + $0x6] ss:$8 sm:$0xf] }
 0x1c9   :  { %v440_v47 = vmax.f32 %v439_v46, 0.0  ;;  %v1350_v46 = vld [vmem:[%s1476_s1 + $0x5] ss:$8 sm:$0xf] }
 0x1cb   :  { %v441_v48 = vadd.f32 1e-05, %v440_v47  ;;  %v665_v47 = vperm.slane %v944_v45, 2 }
 0x1cd   :  { %968 = vrsqrt.f32 %v441_v48  ;;  %vm448_vm10 = vweird.f32 %v441_v48 }
 0x1d3   :  { %v969_v49 = vpop.eup %968 }
 0x1d4   :  { %v443_v50 = vmul.f32 %v969_v49, %v441_v48  ;;  %vm449_vm9 = vweird.f32 %v969_v49  ;;  %v666_v48 = vperm.slane %v944_v45, 3 }
 0x1d5   :  { %vm450_vm11 = vmor %vm448_vm10, %vm449_vm9 }
 0x1d6   :  { %v444_v51 = vmul.f32 %v969_v49, %v443_v50 }
 0x1d8   :  { %v445_v52 = vmul.f32 0.5, %v444_v51  ;;  %v636_v51 = vperm.slane %v1350_v46, 3 }
 0x1da   :  { %v446_v53 = vsub.f32 1.5, %v445_v52 }
 0x1dc   :  { %v447_v55 = vmul.f32 %v969_v49, %v446_v53 }
 0x1de   :  { %v451_v56 = vsel %vm450_vm11, %v969_v49, %v447_v55  ;;  %v1355_v49 = vld [vmem:[%s1476_s1 + $0x4] ss:$8 sm:$0xf] }
 0x1df   :  { %v452_v57 = vmul.f32 %v451_v56, %v1239_v54 }
 0x1e1   :  { %461 = vperm.xlu1 %963, %v452_v57   ;;  %v453_v58 = vmul.f32 %v452_v57, %v427_v42 }
 0x1e9   :  { %455 = vrot.lane.b32.xlu1 %v453_v58, %s976_s0 }
 0x1ea   :  { %964 = vset.pattern.permute.xlu1 %v981_v59  ;;  %v606_v59 = vperm.slane %v1355_v49, 3 }
 0x253   :  { %v462_v60 = vpop.permute.xlu1 %461 }
 0x254   :  { %v464_v63 = vmul.f32 %v462_v60, %v358_v30  ;;  %v466_v0 = vmul.f32 %v462_v60, %v398_v28  ;;  %v467_v5 = vmul.f32 %v462_v60, %v418_v29  ;;  %v465_v11 = vmul.f32 %v462_v60, %v378_v31 }
 0x25b   :  { %v456_v61 = vpop.permute.xlu1 %455 }
 0x25c   :  { %v458_v62 = vsub.f32 %v1239_v54, %v456_v61  ;;  %v1368_v61 = vld [vmem:[%s1476_s1 + $0x3] ss:$8 sm:$0xf] }
 0x25e   :  { %470 = vperm.xlu1 %964, %v458_v62  }
 0x2d0   :  { %v471_v4 = vpop.permute.xlu1 %470 }
 0x2d1   :  { %v473_v6 = vadd.f32 %v471_v4, %v464_v63  ;;  %v475_v8 = vadd.f32 %v471_v4, %v466_v0  ;;  %v476_v12 = vadd.f32 %v471_v4, %v467_v5  ;;  %v474_v13 = vadd.f32 %v471_v4, %v465_v11 }
 0x2d2   :  { %v635_v63 = vperm.slane %v1350_v46, 2  ;;  %v588_v4 = vperm.slane %v1368_v61, 3 }
 0x2d3   :  { %v1244_v9 = vmax.f32 %v473_v6, 0.0  ;;  %v1246_v10 = vmax.f32 %v475_v8, 0.0  ;;  %v1254_v15 = vmax.f32 %v476_v12, 0.0  ;;  %v1256_v16 = vmax.f32 %v474_v13, 0.0 }
 0x2d4   :  { %v605_v8 = vperm.slane %v1355_v49, 2 }
 0x2d5   :  { %683 = vrot.lane.b32.xlu2 %v1246_v10, %s972_s22  ;;  %713 = vrot.lane.b32.xlu1 %v1246_v10, %s973_s23  ;;  %v614_v62 = vmul.f32 %v606_v59, %v1254_v15 }
 0x2d6   :  { %709 = vrot.lane.b32.xlu0 %v1244_v9, %s973_s23 }
 0x2dd   :  { %715 = vrot.lane.b32.xlu1 %v1254_v15, %s973_s23  ;;  %679 = vrot.lane.b32.xlu2 %v1244_v9, %s972_s22 }
 0x2de   :  { %711 = vrot.lane.b32.xlu0 %v1256_v16, %s973_s23 }
 0x2e5   :  { %685 = vrot.lane.b32.xlu1 %v1254_v15, %s972_s22  ;;  %625 = vrot.lane.b32.xlu2 %v1254_v15, %s975_s29 }
 0x2e6   :  { %649 = vrot.lane.b32.xlu0 %v1244_v9, %s974_s26 }
 0x2ed   :  { %653 = vrot.lane.b32.xlu1 %v1246_v10, %s974_s26  ;;  %619 = vrot.lane.b32.xlu2 %v1244_v9, %s975_s29 }
 0x2ee   :  { %651 = vrot.lane.b32.xlu0 %v1256_v16, %s974_s26 }
 0x2f5   :  { %655 = vrot.lane.b32.xlu1 %v1254_v15, %s974_s26  ;;  %575 = vrot.lane.b32.xlu2 %v1246_v10, %s976_s0 }
 0x2f6   :  { %621 = vrot.lane.b32.xlu0 %v1256_v16, %s975_s29 }
 0x2fd   :  { %623 = vrot.lane.b32.xlu1 %v1246_v10, %s975_s29  ;;  %545 = vrot.lane.b32.xlu2 %v1246_v10, %s977_s30 }
 0x2fe   :  { %577 = vrot.lane.b32.xlu0 %v1254_v15, %s976_s0 }
 0x305   :  { %681 = vrot.lane.b32.xlu1 %v1256_v16, %s972_s22  ;;  %515 = vrot.lane.b32.xlu2 %v1246_v10, %s978_s6 }
 0x306   :  { %547 = vrot.lane.b32.xlu0 %v1254_v15, %s977_s30 }
 0x30d   :  { %573 = vrot.lane.b32.xlu1 %v1256_v16, %s976_s0  ;;  %483 = vrot.lane.b32.xlu2 %v1256_v16, %s979_s7 }
 0x30e   :  { %485 = vrot.lane.b32.xlu0 %v1246_v10, %s979_s7 }
 0x315   :  { %543 = vrot.lane.b32.xlu1 %v1256_v16, %s977_s30  ;;  %541 = vrot.lane.b32.xlu2 %v1244_v9, %s977_s30 }
 0x316   :  { %487 = vrot.lane.b32.xlu0 %v1254_v15, %s979_s7 }
 0x31d   :  { %513 = vrot.lane.b32.xlu1 %v1256_v16, %s978_s6  ;;  %481 = vrot.lane.b32.xlu2 %v1244_v9, %s979_s7 }
 0x325   :  { %571 = vrot.lane.b32.xlu1 %v1244_v9, %s976_s0 }
 0x32d   :  { %517 = vrot.lane.b32.xlu1 %v1254_v15, %s978_s6 }
 0x32f   :  { %v1316_v17 = vpop.permute.xlu2 %683 }
 0x335   :  { %511 = vrot.lane.b32.xlu1 %v1244_v9, %s978_s6 }
 0x337   :  { %v1321_v25 = vpop.permute.xlu2 %679 }
 0x33f   :  { %v626_v41 = vpop.permute.xlu2 %625 }
 0x347   :  { %v714_v14 = vpop.permute.xlu1 %713  ;;  %v620_v44 = vpop.permute.xlu2 %619 }
 0x348   :  { %v710_v18 = vpop.permute.xlu0 %709  ;;  %v630_v52 = vsel %vm180_vm3, %v626_v41, %v620_v44 }
 0x349   :  { %v644_v60 = vmul.f32 %v636_v51, %v630_v52 }
 0x34f   :  { %v716_v24 = vpop.permute.xlu1 %715  ;;  %v576_v0 = vpop.permute.xlu2 %575 }
 0x350   :  { %v717_v2 = vsel %vm276_vm0, %v714_v14, %v716_v24  ;;  %v720_v26 = vsel %vm276_vm0, %v716_v24, %v710_v18  ;;  %v712_v27 = vpop.permute.xlu0 %711  ;;  %v664_v24 = vperm.slane %v944_v45, 1 }
 0x351   :  { %v718_v28 = vsel %vm276_vm0, %v712_v27, %v714_v14  ;;  %v719_v29 = vsel %vm276_vm0, %v710_v18, %v712_v27  ;;  %v733_v30 = vmul.f32 %v725_v20, %v717_v2  ;;  %v734_v31 = vmul.f32 %v726_v21, %v720_v26  ;;  %v1385_v18 = vld [vmem:[%s1476_s1 + $0x2] ss:$8 sm:$0xf] }
 0x352   :  { %v731_v1 = vmul.f32 %v723_v22, %v719_v29  ;;  %v732_v3 = vmul.f32 %v724_v23, %v718_v28  ;;  %v613_v14 = vmul.f32 %v605_v8, %v1246_v10  ;;  %v694_v20 = vperm.slane %v1334_v32, 1 }
 0x353   :  { %826 = vmatpush.msrb.mxu2 %v733_v30  ;;  %846 = vmatpush.msrb.mxu3 %v734_v31  ;;  %v558_v21 = vperm.slane %v1385_v18, 3  ;;  %v663_v23 = vperm.slane %v944_v45, 0  ;;  %v633_v2 = vperm.slane %v1350_v46, 0  ;;  %v634_v32 = vperm.slane %v1350_v46, 1 }
 0x354   :  { %786 = vmatpush.msrb.mxu0 %v731_v1  ;;  %806 = vmatpush.msrb.mxu1 %v732_v3  ;;  %v555_v8 = vperm.slane %v1385_v18, 0 }
 0x357   :  { %v686_v35 = vpop.permute.xlu1 %685  ;;  %v546_v26 = vpop.permute.xlu2 %545 }
 0x358   :  { %v687_v36 = vsel %vm244_vm1, %v1316_v17, %v686_v35  ;;  %v690_v37 = vsel %vm244_vm1, %v686_v35, %v1321_v25  ;;  %v650_v38 = vpop.permute.xlu0 %649 }
 0x359   :  { %v703_v39 = vmul.f32 %v695_v33, %v687_v36  ;;  %v704_v40 = vmul.f32 %v696_v34, %v690_v37  ;;  %v604_v37 = vperm.slane %v1355_v49, 1 }
 0x35b   :  { %827 = vmatpush.msrb.mxu2 %v703_v39  ;;  %847 = vmatpush.msrb.mxu3 %v704_v40  ;;  %v587_v40 = vperm.slane %v1368_v61, 2 }
 0x35f   :  { %v654_v42 = vpop.permute.xlu1 %653  ;;  %v516_v46 = vpop.permute.xlu2 %515 }
 0x360   :  { %v652_v43 = vpop.permute.xlu0 %651 }
 0x361   :  { %v658_v10 = vsel %vm212_vm2, %v652_v43, %v654_v42  ;;  %v659_v27 = vsel %vm212_vm2, %v650_v38, %v652_v43  ;;  %v612_v43 = vmul.f32 %v604_v37, %v1256_v16 }
 0x362   :  { %v672_v36 = vmul.f32 %v664_v24, %v658_v10 }
 0x367   :  { %v656_v50 = vpop.permute.xlu1 %655  ;;  %v484_v16 = vpop.permute.xlu2 %483 }
 0x368   :  { %v657_v53 = vsel %vm212_vm2, %v654_v42, %v656_v50  ;;  %v660_v55 = vsel %vm212_vm2, %v656_v50, %v650_v38  ;;  %v622_v56 = vpop.permute.xlu0 %621 }
 0x369   :  { %v673_v57 = vmul.f32 %v665_v47, %v657_v53  ;;  %v674_v58 = vmul.f32 %v666_v48, %v660_v55  ;;  %v629_v33 = vsel %vm180_vm3, %v620_v44, %v622_v56  ;;  %v557_v47 = vperm.slane %v1385_v18, 2  ;;  %v493_v53 = vld [vmem:[%s1476_s1] ss:$8 sm:$0xf] }
 0x36a   :  { %v641_v38 = vmul.f32 %v633_v2, %v629_v33  ;;  %v498_v24 = vperm.slane %v493_v53, 3 }
 0x36b   :  { %828 = vmatpush.msrb.mxu2 %v673_v57  ;;  %848 = vmatpush.msrb.mxu3 %v674_v58 }
 0x36d   :  { %849 = vmatpush.msrb.mxu3 %v644_v60 }
 0x36f   :  { %v624_v6 = vpop.permute.xlu1 %623  ;;  %850 = vmatpush.msrb.mxu3 %v614_v62  ;;  %v739_v62 = vld [vmem:[%s1479_s3] sm:$0xff] }
 0x370   :  { %v627_v5 = vsel %vm180_vm3, %v624_v6, %v626_v41  ;;  %v1376_v11 = vpop.permute.xlu0 %577  ;;  %v628_v34 = vsel %vm180_vm3, %v622_v56, %v624_v6  ;;  %v497_v56 = vperm.slane %v493_v53, 2 }
 0x371   :  { %v579_v12 = vsel %vm129_vm4, %v576_v0, %v1376_v11  ;;  %v643_v13 = vmul.f32 %v635_v63, %v627_v5  ;;  %v642_v39 = vmul.f32 %v634_v32, %v628_v34  ;;  %v585_v63 = vperm.slane %v1368_v61, 0 }
 0x372   :  { %v596_v15 = vmul.f32 %v588_v4, %v579_v12  ;;  %v542_v4 = vpop.permute.xlu2 %541  ;;  %v556_v5 = vperm.slane %v1385_v18, 1 }
 0x373   :  { %829 = vmatpush.msrb.mxu2 %v643_v13 }
 0x374   :  { %851 = vmatpush.msrb.mxu3 %v596_v15 }
 0x375   :  { %830 = vmatpush.msrb.mxu2 %v613_v14 }
 0x377   :  { %v682_v22 = vpop.permute.xlu1 %681 }
 0x378   :  { %v688_v28 = vsel %vm244_vm1, %v682_v22, %v1316_v17  ;;  %v689_v29 = vsel %vm244_vm1, %v1321_v25, %v682_v22  ;;  %v548_v30 = vpop.permute.xlu0 %547  ;;  %v671_v17 = vmul.f32 %v663_v23, %v659_v27  ;;  %v603_v25 = vperm.slane %v1355_v49, 0 }
 0x379   :  { %v549_v31 = vsel %vm97_vm5, %v546_v26, %v548_v30  ;;  %v701_v1 = vmul.f32 %v693_v19, %v689_v29  ;;  %v702_v3 = vmul.f32 %v694_v20, %v688_v28  ;;  %v552_v12 = vsel %vm97_vm5, %v548_v30, %v542_v4 }
 0x37a   :  { %v566_v35 = vmul.f32 %v558_v21, %v549_v31  ;;  %v611_v42 = vmul.f32 %v603_v25, %v1244_v9  ;;  %v939_v9 = vld [vmem:[%s1476_s1 + $0x1] ss:$8 sm:$0xf]  ;;  %v563_v20 = vmul.f32 %v555_v8, %v552_v12  ;;  %v482_v27 = vpop.permute.xlu2 %481  ;;  %v495_v31 = vperm.slane %v493_v53, 0 }
 0x37b   :  { %787 = vmatpush.msrb.mxu0 %v701_v1  ;;  %807 = vmatpush.msrb.mxu1 %v702_v3  ;;  %v527_v52 = vperm.slane %v939_v9, 2  ;;  %v528_v22 = vperm.slane %v939_v9, 3  ;;  %v525_v28 = vperm.slane %v939_v9, 0  ;;  %v526_v29 = vperm.slane %v939_v9, 1 }
 0x37c   :  { %852 = vmatpush.msrb.mxu3 %v566_v35  ;;  %v496_v1 = vperm.slane %v493_v53, 1  ;;  %v491_v3 = vsel %vm34_vm7, %v482_v27, %v484_v16 }
 0x37d   :  { %788 = vmatpush.msrb.mxu0 %v671_v17  ;;  %808 = vmatpush.msrb.mxu1 %v672_v36 }
 0x37e   :  { %v504_v25 = vmul.f32 %v496_v1, %v491_v3 }
 0x37f   :  { %v574_v41 = vpop.permute.xlu1 %573  ;;  %789 = vmatpush.msrb.mxu0 %v641_v38  ;;  %809 = vmatpush.msrb.mxu1 %v642_v39 }
 0x380   :  { %v580_v44 = vsel %vm129_vm4, %v574_v41, %v576_v0  ;;  %v486_v51 = vpop.permute.xlu0 %485  ;;  %v586_v0 = vperm.slane %v1368_v61, 1 }
 0x381   :  { %790 = vmatpush.msrb.mxu0 %v611_v42  ;;  %810 = vmatpush.msrb.mxu1 %v612_v43  ;;  %v595_v45 = vmul.f32 %v587_v40, %v580_v44  ;;  %v490_v57 = vsel %vm34_vm7, %v484_v16, %v486_v51 }
 0x382   :  { %v505_v60 = vmul.f32 %v497_v56, %v490_v57 }
 0x383   :  { %831 = vmatpush.msrb.mxu2 %v595_v45 }
 0x387   :  { %v544_v48 = vpop.permute.xlu1 %543 }
 0x388   :  { %v550_v49 = vsel %vm97_vm5, %v544_v48, %v546_v26  ;;  %v551_v13 = vsel %vm97_vm5, %v542_v4, %v544_v48  ;;  %v488_v18 = vpop.permute.xlu0 %487 }
 0x389   :  { %v565_v50 = vmul.f32 %v557_v47, %v550_v49  ;;  %v564_v21 = vmul.f32 %v556_v5, %v551_v13  ;;  %v489_v2 = vsel %vm34_vm7, %v486_v51, %v488_v18  ;;  %v492_v32 = vsel %vm34_vm7, %v488_v18, %v482_v27 }
 0x38a   :  { %v503_v36 = vmul.f32 %v495_v31, %v492_v32  ;;  %v982_v51 = vmov 2   ;;  %v983_v5 = vmov 3  }
 0x38b   :  { %832 = vmatpush.msrb.mxu2 %v565_v50  ;;  %965 = vset.pattern.permute.xlu2 %v982_v51 }
 0x38c   :  { %967 = vset.pattern.permute.xlu0 %v983_v5 }
 0x38f   :  { %v514_v55 = vpop.permute.xlu1 %513 }
 0x390   :  { %v520_v58 = vsel %vm65_vm6, %v514_v55, %v516_v46 }
 0x391   :  { %v535_v59 = vmul.f32 %v527_v52, %v520_v58 }
 0x393   :  { %833 = vmatpush.msrb.mxu2 %v535_v59 }
 0x395   :  { %834 = vmatpush.msrb.mxu2 %v505_v60 }
 0x396   :  { %949 = vmatmul.msk.f32.vlgmr.msrb.gmra.mxu2 %vm337_vm8, %v739_v62 }
 0x397   :  { %v572_v6 = vpop.permute.xlu1 %571 }
 0x398   :  { %v581_v15 = vsel %vm129_vm4, %v572_v6, %v574_v41  ;;  %v582_v61 = vsel %vm129_vm4, %v1376_v11, %v572_v6  ;;  %v506_v11 = vmul.f32 %v498_v24, %v489_v2 }
 0x399   :  { %v593_v14 = vmul.f32 %v585_v63, %v582_v61  ;;  %v594_v19 = vmul.f32 %v586_v0, %v581_v15 }
 0x39b   :  { %791 = vmatpush.msrb.mxu0 %v593_v14  ;;  %811 = vmatpush.msrb.mxu1 %v594_v19 }
 0x39d   :  { %792 = vmatpush.msrb.mxu0 %v563_v20  ;;  %812 = vmatpush.msrb.mxu1 %v564_v21 }
 0x39f   :  { %v518_v23 = vpop.permute.xlu1 %517 }
 0x3a0   :  { %v519_v26 = vsel %vm65_vm6, %v516_v46, %v518_v23 }
 0x3a1   :  { %v536_v10 = vmul.f32 %v528_v22, %v519_v26 }
 0x3a3   :  { %853 = vmatpush.msrb.mxu3 %v536_v10 }
 0x3a5   :  { %854 = vmatpush.msrb.mxu3 %v506_v11 }
 0x3a6   :  { %950 = vmatmul.msk.f32.vlgmr.msrb.gmra.mxu3 %vm337_vm8, %v739_v62 }
 0x3a7   :  { %v512_v30 = vpop.permute.xlu1 %511 }
 0x3a8   :  { %v521_v33 = vsel %vm65_vm6, %v512_v30, %v514_v55  ;;  %v522_v34 = vsel %vm65_vm6, %v518_v23, %v512_v30 }
 0x3a9   :  { %v533_v35 = vmul.f32 %v525_v28, %v522_v34  ;;  %v534_v17 = vmul.f32 %v526_v29, %v521_v33 }
 0x3ab   :  { %793 = vmatpush.msrb.mxu0 %v533_v35  ;;  %813 = vmatpush.msrb.mxu1 %v534_v17 }
 0x3ad   :  { %794 = vmatpush.msrb.mxu0 %v503_v36  ;;  %814 = vmatpush.msrb.mxu1 %v504_v25 }
 0x3ae   :  { %947 = vmatmul.msk.f32.vlgmr.msrb.gmra.mxu0 %vm337_vm8, %v739_v62  ;;  %948 = vmatmul.msk.f32.vlgmr.msrb.gmra.mxu1 %vm337_vm8, %v739_v62 }
 0x419   :  { %v836_v37 = vpop.f32.mrf.mxu2 }
 0x41a   :  { %v868_v43 = vmul.f32 %v836_v37, %v836_v37 }
 0x429   :  { %v856_v38 = vpop.f32.mrf.mxu3 }
 0x42a   :  { %v869_v46 = vmul.f32 %v856_v38, %v856_v38 }
 0x42b   :  { %v796_v39 = vpop.f32.mrf.mxu0  ;;  %v816_v40 = vpop.f32.mrf.mxu1 }
 0x42c   :  { %v866_v41 = vmul.f32 %v796_v39, %v796_v39  ;;  %v860_v42 = vadd.f32 %v816_v40, %v796_v39  ;;  %v867_v7 = vmul.f32 %v816_v40, %v816_v40 }
 0x42e   :  { %v870_v44 = vadd.f32 %v867_v7, %v866_v41  ;;  %v861_v45 = vadd.f32 %v860_v42, %v836_v37 }
 0x430   :  { %v862_v47 = vadd.f32 %v861_v45, %v856_v38  ;;  %v871_v48 = vadd.f32 %v870_v44, %v868_v43 }
 0x432   :  { %863 = vadd.xlane.f32.xlu0 %v862_v47  ;;  %v872_v49 = vadd.f32 %v871_v48, %v869_v46 }
 0x434   :  { %873 = vadd.xlane.f32.xlu1 %v872_v49 }
 0x4a5   :  { %v864_v50 = vpop.xlane.xlu0 %863 }
 0x4a6   :  { %v865_v9 = vmul.f32 0.001953125, %v864_v50 }
 0x4a7   :  { %v874_v16 = vpop.xlane.xlu1 %873 }
 0x4a8   :  { %v876_v52 = vmul.f32 %v865_v9, %v865_v9  ;;  %v875_v53 = vmul.f32 0.001953125, %v874_v16 }
 0x4aa   :  { %v877_v55 = vsub.f32 %v875_v53, %v876_v52 }
 0x4ac   :  { %v878_v56 = vmax.f32 %v877_v55, 0.0 }
 0x4ae   :  { %v879_v57 = vadd.f32 1e-05, %v878_v56 }
 0x4b0   :  { %970 = vrsqrt.f32 %v879_v57  ;;  %vm886_vm13 = vweird.f32 %v879_v57 }
 0x4b6   :  { %v971_v58 = vpop.eup %970 }
 0x4b7   :  { %v881_v59 = vmul.f32 %v971_v58, %v879_v57  ;;  %vm887_vm12 = vweird.f32 %v971_v58 }
 0x4b8   :  { %vm888_vm14 = vmor %vm886_vm13, %vm887_vm12 }
 0x4b9   :  { %v882_v60 = vmul.f32 %v971_v58, %v881_v59 }
 0x4bb   :  { %v883_v62 = vmul.f32 0.5, %v882_v60 }
 0x4bd   :  { %v884_v63 = vsub.f32 1.5, %v883_v62 }
 0x4bf   :  { %v885_v0 = vmul.f32 %v971_v58, %v884_v63 }
 0x4c1   :  { %v889_v4 = vsel %vm888_vm14, %v971_v58, %v885_v0 }
 0x4c2   :  { %v890_v6 = vmul.f32 %v889_v4, %v1239_v54 }
 0x4c4   :  { %v891_v8 = vmul.f32 %v890_v6, %v865_v9 }
 0x4c6   :  { %893 = vrot.lane.b32.xlu2 %v891_v8, %s976_s0 }
 0x4ce   :  { %899 = vperm.xlu2 %965, %v890_v6  }
 0x4d6   :  { %966 = vset.pattern.permute.xlu2 %v983_v5 }
 0x520   :  { %v894_v12 = vpop.permute.xlu2 %893 }
 0x521   :  { %v896_v13 = vsub.f32 %v1239_v54, %v894_v12 }
 0x523   :  { %908 = vperm.xlu2 %966, %v896_v13  }
 0x528   :  { %v900_v15 = vpop.permute.xlu2 %899 }
 0x529   :  { %v902_v61 = vmul.f32 %v900_v15, %v796_v39  ;;  %v903_v14 = vmul.f32 %v900_v15, %v816_v40  ;;  %v904_v19 = vmul.f32 %v900_v15, %v836_v37  ;;  %v905_v20 = vmul.f32 %v900_v15, %v856_v38 }
 0x57d   :  { %v909_v21 = vpop.permute.xlu2 %908 }
 0x57e   :  { %v911_v18 = vadd.f32 %v909_v21, %v902_v61  ;;  %v912_v22 = vadd.f32 %v909_v21, %v903_v14  ;;  %v913_v23 = vadd.f32 %v909_v21, %v904_v19  ;;  %v914_v24 = vadd.f32 %v909_v21, %v905_v20 }
 0x580   :  { %v915_v2 = vmax.f32 %v911_v18, 0.0  ;;  %v916_v26 = vmax.f32 %v912_v22, 0.0  ;;  %v917_v10 = vmax.f32 %v913_v23, 0.0  ;;  %v918_v11 = vmax.f32 %v914_v24, 0.0 }
 0x582   :  { %919 = vst [vmem:[%s1480_s5] sm:$0xff] %v915_v2 }
 0x583   :  { %920 = vst [vmem:[%s1480_s5 + $0x8] sm:$0xff] %v916_v26 }
 0x584   :  { %921 = vst [vmem:[%s1480_s5 + $0x10] sm:$0xff] %v917_v10 }
 0x585   :  { %922 = vst [vmem:[%s1480_s5 + $0x18] sm:$0xff] %v918_v11 }

</bundles_post_ra>
